<compile_context>
chip_gen: v7x
topology: tpu7x:2x2x1
jax: 0.10.0
libtpu: 0.0.40
codegen_flags: <defaults>
</compile_context>

<pallas_src>
import functools

import jax
import jax.numpy as jnp
from jax.experimental import pallas as pl
from jax.experimental.pallas import tpu as pltpu

LANE = 128
BN_EPS = 1e-5


def _ceil(n, m):
    return (n + m - 1) // m * m


# ---------------------------------------------------------------------------
# One-time per-graph preprocessing (structure only; reused every layer/step).
# Node types: 'A' (n_a nodes), 'B' (n_b nodes).
# Canonical edge types (adjacency rows = dst, cols = src):
#     aa: A->A    ba: B->A    ab: A->B
# Everything is laid out along ONE stacked dst-node axis:
#     rows = [A dst segment (n_a_p rows) ; B dst segment (n_b_p rows)]
# so the whole layer runs as a single dst-row-tiled grid.
# ---------------------------------------------------------------------------
def preprocess_graph(adjs, n_a, n_b, feat_dim, *, tile_rows=None):
    dp = _ceil(feat_dim, LANE)

    # dst-row tile size: big tiles amortize per-step overhead, but the
    # double-buffered bf16 adjacency tiles must stay inside a conservative
    # per-step VMEM budget (v7x has only 64 MiB physical VMEM).
    tm = tile_rows or 128
    adj_cols = _ceil(n_a, 8) + _ceil(n_b, 8)
    while tm > 8 and 2 * 2 * tm * adj_cols * 2 > (12 << 20):
        tm //= 2
    tm = max(8, min(tm, _ceil(max(n_a, n_b), 8)))

    n_a_p = _ceil(n_a, tm)          # padded A segment (tiles never straddle segments)
    n_b_p = _ceil(n_b, tm)          # padded B segment
    ndst = n_a_p + n_b_p
    nt = ndst // tm                 # number of dst-row tiles (grid size)
    tiles_a = n_a_p // tm           # tiles belonging to the A dst segment

    a_aa = adjs['aa'].astype(jnp.float32)   # (n_a, n_a)  dst A, src A
    a_ab = adjs['ab'].astype(jnp.float32)   # (n_b, n_a)  dst B, src A
    a_ba = adjs['ba'].astype(jnp.float32)   # (n_a, n_b)  dst A, src B

    def row_norm(a):                 # fold 1/in-degree into the adjacency rows
        deg = jnp.sum(a, axis=1, keepdims=True)
        return a / jnp.where(deg > 0, deg, 1.0), deg

    aa_n, deg_aa = row_norm(a_aa)
    ab_n, deg_ab = row_norm(a_ab)
    ba_n, deg_ba = row_norm(a_ba)

    # adjacency grouped by SOURCE type; rows follow the stacked dst layout.
    adj_a = jnp.zeros((ndst, n_a_p), jnp.float32)           # src = A nodes
    adj_a = adj_a.at[:n_a, :n_a].set(aa_n)                   # dst-A rows: etype aa
    adj_a = adj_a.at[n_a_p:n_a_p + n_b, :n_a].set(ab_n)      # dst-B rows: etype ab
    adj_b = jnp.zeros((ndst, n_b_p), jnp.float32)            # src = B nodes
    adj_b = adj_b.at[:n_a, :n_b].set(ba_n)                   # dst-A rows: etype ba

    # per-dst-node count of incident etypes with >=1 in-edge (feat_dst factor).
    cnt_a = (deg_aa > 0).astype(jnp.float32) + (deg_ba > 0).astype(jnp.float32)
    cnt_b = (deg_ab > 0).astype(jnp.float32)
    cnt = jnp.zeros((ndst, 1), jnp.float32)
    cnt = cnt.at[:n_a].set(cnt_a)
    cnt = cnt.at[n_a_p:n_a_p + n_b].set(cnt_b)

    graph = {'adj_a': adj_a.astype(jnp.bfloat16),   # 1/deg folded; ~0.2% rel rounding
             'adj_b': adj_b.astype(jnp.bfloat16),
             'cnt': cnt}
    meta = dict(n_a=n_a, n_b=n_b, n_a_p=n_a_p, n_b_p=n_b_p, ndst=ndst,
                nt=nt, tm=tm, tiles_a=tiles_a, dp=dp, feat_dim=feat_dim)
    return graph, meta


def pack_params(w1, gamma, beta, w2, b2, meta):
    """One-time lane padding of the MLP parameters.

    NOTE: padding MUST be zeros.  Pad-lane inertness relies on gamma/beta/b2
    and the pad rows/cols of w1/w2 being zero (pad-column BN scale becomes
    rsqrt(eps) * 0 = 0), so pad lanes of the output stay exactly equal to the
    (zero) pad lanes of the input features.
    """
    dp, d = meta['dp'], meta['feat_dim']

    def pad_vec(v):
        return jnp.pad(jnp.reshape(v, (1, d)).astype(jnp.float32),
                       ((0, 0), (0, dp - d)))

    def pad_mat(m):
        return jnp.pad(m.astype(jnp.float32),
                       ((0, dp - m.shape[0]), (0, dp - m.shape[1])))

    return {'w1': pad_mat(w1).astype(jnp.bfloat16),   # bf16 MXU operands
            'w2': pad_mat(w2).astype(jnp.bfloat16),
            'gbb': jnp.concatenate([pad_vec(gamma), pad_vec(beta),
                                    pad_vec(b2)], axis=0)}       # (3, Dp) f32


def pack_feats(feats, meta):
    """Pack per-type features into the persistent stacked, lane-padded layout."""
    d, dp = meta['feat_dim'], meta['dp']
    f = jnp.zeros((meta['ndst'], dp), jnp.float32)
    f = f.at[:meta['n_a'], :d].set(feats['A'].astype(jnp.float32))
    f = f.at[meta['n_a_p']:meta['n_a_p'] + meta['n_b'], :d].set(
        feats['B'].astype(jnp.float32))
    return f


def unpack_feats(packed, meta):
    d, n_a_p = meta['feat_dim'], meta['n_a_p']
    return {'A': packed[:meta['n_a'], :d],
            'B': packed[n_a_p:n_a_p + meta['n_b'], :d]}


# ---------------------------------------------------------------------------
# Pass 1: per-etype mean aggregation + cross-etype sum + k @ W1 + partial BN
#         statistics, one dst-row tile per grid step.
# ---------------------------------------------------------------------------
def _agg_h_kernel(cnt_ref, adja_ref, adjb_ref, feat_ref, vecs_ref, w1_ref,
                  h_ref, stats_ref, *, tiles_a, n_a_p, n_b_p, tm):
    i = pl.program_id(0)

    fa = feat_ref[0:n_a_p, :]                          # src A features (resident)
    fb = feat_ref[n_a_p:n_a_p + n_b_p, :]              # src B features (resident)

    # The emb row scaling the src-A features depends on which dst segment this
    # tile belongs to (e_aa for dst-A rows, e_ab for dst-B rows); note
    # (A @ F) * e == A @ (F * e), so fold emb into the source features.
    is_a = (i < tiles_a).astype(jnp.float32)
    e_src_a = is_a * vecs_ref[0:1, :] + (1.0 - is_a) * vecs_ref[2:3, :]
    s_a = (fa * e_src_a).astype(jnp.bfloat16)
    s_b = (fb * vecs_ref[1:2, :]).astype(jnp.bfloat16)

    # mean-aggregated neighbour messages (1/deg folded into adjacency rows);
    # bf16 MXU operands, f32 accumulation.
    agg = (jnp.dot(adja_ref[...], s_a, preferred_element_type=jnp.float32)
           + jnp.dot(adjb_ref[...], s_b, preferred_element_type=jnp.float32))

    row0 = pl.multiple_of(i * tm, tm)
    f_tile = feat_ref[pl.ds(row0, tm), :]              # this tile's dst features
    # k = sum over incident etypes of (feat_dst - mean(feat_src) * emb_e);
    # etypes with zero in-degree contribute 0 (zero adj row + cnt).
    k = cnt_ref[...] * f_tile - agg                    # (TM, Dp) f32

    h = jnp.dot(k.astype(jnp.bfloat16), w1_ref[...],
                preferred_element_type=jnp.float32)    # Linear(D, D, bias=False)
    h_ref[...] = h

    # per-tile BatchNorm partial statistics (column sum / sum of squares);
    # padded rows have k == h == 0 so they contribute nothing.
    s = jnp.sum(h, axis=0, keepdims=True)
    ss = jnp.sum(h * h, axis=0, keepdims=True)
    stats_ref[...] = jnp.concatenate(
        [s, ss, jnp.zeros((6, s.shape[-1]), jnp.float32)], axis=0)


# ---------------------------------------------------------------------------
# Pass 2: BatchNorm (training batch stats) + ReLU + @ W2 + bias + residual.
# ---------------------------------------------------------------------------
def _bn_mlp_res_kernel(stats_ref, h_ref, feat_ref, vecs_ref, w2_ref, out_ref,
                       *, n_real):
    gamma = vecs_ref[3:4, :]
    beta = vecs_ref[4:5, :]
    b2 = vecs_ref[5:6, :]

    # reduce the per-tile partial statistics (rows 8*t are sums, 8*t+1 sum-sq).
    st = stats_ref[...]
    row = jax.lax.broadcasted_iota(jnp.int32, st.shape, 0)
    s = jnp.sum(jnp.where(row % 8 == 0, st, 0.0), axis=0, keepdims=True)
    ss = jnp.sum(jnp.where(row % 8 == 1, st, 0.0), axis=0, keepdims=True)

    inv_n = 1.0 / float(n_real)
    mean = s * inv_n
    var = jnp.maximum(ss * inv_n - mean * mean, 0.0)   # biased variance (BN train)
    scale = jax.lax.rsqrt(var + BN_EPS) * gamma
    shift = beta - mean * scale

    hr = jnp.maximum(h_ref[...] * scale + shift, 0.0)              # BN + ReLU
    y = jnp.dot(hr.astype(jnp.bfloat16), w2_ref[...],
                preferred_element_type=jnp.float32) + b2           # Linear(D, D)
    out_ref[...] = feat_ref[...] + y                               # residual
    # NOTE: padded dst rows get a harmless non-zero value here; they are never
    # read (zero adjacency columns / zero cnt) and are dropped by unpack_feats.


# ---------------------------------------------------------------------------
# Layer forward.  `graph`/`meta` come from preprocess_graph (reused across
# layers); `feat_packed` is the persistent stacked lane-padded feature matrix.
# ---------------------------------------------------------------------------
def gcn_node_forward(graph, feat_packed, emb, params, *, meta, edge_dict):
    dp, d = meta['dp'], meta['feat_dim']
    tm, nt, tiles_a = meta['tm'], meta['nt'], meta['tiles_a']
    n_a_p, n_b_p, ndst = meta['n_a_p'], meta['n_b_p'], meta['ndst']
    n_real = meta['n_a'] + meta['n_b']

    adj_a, adj_b, cnt = graph['adj_a'], graph['adj_b'], graph['cnt']
    w1, w2 = params['w1'], params['w2']

    # packed row-vector params: [emb_aa, emb_ba, emb_ab, gamma, beta, b2]
    emb_p = jnp.pad(emb.astype(jnp.float32), ((0, 0), (0, dp - d)))
    vecs = jnp.concatenate([emb_p[edge_dict['aa']][None],
                            emb_p[edge_dict['ba']][None],
                            emb_p[edge_dict['ab']][None],
                            params['gbb']], axis=0)              # (6, Dp) f32

    # VMEM budget (double-buffered streamed tiles + resident operands).
    vmem1 = (ndst * dp * 4 + 2 * tm * (n_a_p + n_b_p) * 2 + 2 * dp * dp * 2
             + 2 * tm * dp * 4 + 2 * 8 * dp * 4 + 2 * tm * 4 + 6 * dp * 4)
    vmem2 = (nt * 8 * dp * 4 + 2 * 2 * tm * dp * 4 + 2 * dp * dp * 2
             + 6 * dp * 4 + 2 * tm * dp * 4)
    vmem_limit = int(min(48 << 20, max(16 << 20, 2 * max(vmem1, vmem2))))

    # ---- pass 1: aggregation + k @ W1 + partial BN stats ------------------
    kernel1 = functools.partial(_agg_h_kernel, tiles_a=tiles_a,
                                n_a_p=n_a_p, n_b_p=n_b_p, tm=tm)
    h, stats = pl.pallas_call(
        kernel1,
        out_shape=(jax.ShapeDtypeStruct((ndst, dp), jnp.float32),
                   jax.ShapeDtypeStruct((nt * 8, dp), jnp.float32)),
        grid_spec=pltpu.PrefetchScalarGridSpec(
            num_scalar_prefetch=0,
            grid=(nt,),
            in_specs=[pl.BlockSpec((tm, 1), lambda i: (i, 0)),        # cnt
                      pl.BlockSpec((tm, n_a_p), lambda i: (i, 0)),    # adj (src A)
                      pl.BlockSpec((tm, n_b_p), lambda i: (i, 0)),    # adj (src B)
                      pl.BlockSpec((ndst, dp), lambda i: (0, 0)),     # features (resident)
                      pl.BlockSpec((6, dp), lambda i: (0, 0)),        # packed vectors
                      pl.BlockSpec((dp, dp), lambda i: (0, 0))],      # W1 (bf16)
            out_specs=(pl.BlockSpec((tm, dp), lambda i: (i, 0)),      # h = k @ W1
                       pl.BlockSpec((8, dp), lambda i: (i, 0)))),     # per-tile stats
        compiler_params=pltpu.CompilerParams(
            dimension_semantics=("parallel",),
            vmem_limit_bytes=vmem_limit),
        cost_estimate=pl.CostEstimate(
            flops=2 * ndst * (n_a_p + n_b_p) * dp + 2 * ndst * dp * dp,
            transcendentals=0,
            bytes_accessed=(adj_a.size + adj_b.size + w1.size) * 2
                           + (feat_packed.size + cnt.size + vecs.size) * 4
                           + (ndst * dp + nt * 8 * dp) * 4),
    )(cnt, adj_a, adj_b, feat_packed, vecs, w1)

    # ---- pass 2: BatchNorm + ReLU + W2 + bias + residual ------------------
    kernel2 = functools.partial(_bn_mlp_res_kernel, n_real=n_real)
    out = pl.pallas_call(
        kernel2,
        out_shape=jax.ShapeDtypeStruct((ndst, dp), jnp.float32),
        grid_spec=pltpu.PrefetchScalarGridSpec(
            num_scalar_prefetch=0,
            grid=(nt,),
            in_specs=[pl.BlockSpec((nt * 8, dp), lambda i: (0, 0)),   # partial stats
                      pl.BlockSpec((tm, dp), lambda i: (i, 0)),       # h
                      pl.BlockSpec((tm, dp), lambda i: (i, 0)),       # features (residual)
                      pl.BlockSpec((6, dp), lambda i: (0, 0)),        # packed vectors
                      pl.BlockSpec((dp, dp), lambda i: (0, 0))],      # W2 (bf16)
            out_specs=pl.BlockSpec((tm, dp), lambda i: (i, 0))),
        compiler_params=pltpu.CompilerParams(
            dimension_semantics=("parallel",),
            vmem_limit_bytes=vmem_limit),
        cost_estimate=pl.CostEstimate(
            flops=2 * ndst * dp * dp,
            transcendentals=nt * dp,
            bytes_accessed=(3 * ndst * dp + nt * 8 * dp + vecs.size) * 4
                           + w2.size * 2),
        input_output_aliases={2: 0},          # residual feature input -> output
    )(stats, h, feat_packed, vecs, w2)

    return out


# ---------------------------------------------------------------------------
# Pure-JAX reference (mirrors the PyTorch/DGL module) for a correctness check.
# ---------------------------------------------------------------------------
def gcn_node_reference(feats, adjs, emb, edge_dict, params):
    w1, gamma, beta, w2, b2 = params

    def etype_mean(adj, feat_src, feat_dst, e):
        deg = jnp.sum(adj, axis=1, keepdims=True)
        agg = jnp.dot(adj, feat_src, precision='highest')
        safe = jnp.where(deg > 0, deg, 1.0)
        contrib = feat_dst - (agg / safe) * e[None, :]
        return jnp.where(deg > 0, contrib, 0.0)

    k_b = etype_mean(adjs['ab'], feats['A'], feats['B'], emb[edge_dict['ab']])
    k_a = (etype_mean(adjs['ba'], feats['B'], feats['A'], emb[edge_dict['ba']])
           + etype_mean(adjs['aa'], feats['A'], feats['A'], emb[edge_dict['aa']]))
    k = jnp.concatenate([k_a, k_b], axis=0)
    h = jnp.dot(k, w1, precision='highest')
    mean = jnp.mean(h, axis=0, keepdims=True)
    var = jnp.mean((h - mean) ** 2, axis=0, keepdims=True)
    hn = (h - mean) * jax.lax.rsqrt(var + BN_EPS) * gamma + beta
    y = jnp.dot(jnp.maximum(hn, 0.0), w2, precision='highest') + b2
    out = jnp.concatenate([feats['A'], feats['B']], axis=0) + y
    n_a = feats['A'].shape[0]
    return {'A': out[:n_a], 'B': out[n_a:]}


if __name__ == "__main__":
    D = 32            # in_dim == out_dim (required by `feat + k` in the module)
    N_A, N_B = 8, 6
    key = jax.random.PRNGKey(0)
    ks = jax.random.split(key, 9)

    feat_A = jax.random.normal(ks[0], (N_A, D), jnp.float32)
    feat_B = jax.random.normal(ks[1], (N_B, D), jnp.float32)

    edge_dict = {'ab': 0, 'ba': 1, 'aa': 2}
    emb = jax.random.normal(ks[2], (3, D), jnp.float32)

    # dense 0/1 adjacencies (rows = dst nodes, cols = src nodes)
    adjs = {
        'ab': (jax.random.uniform(ks[3], (N_B, N_A)) < 0.5).astype(jnp.float32),
        'ba': (jax.random.uniform(ks[4], (N_A, N_B)) < 0.5).astype(jnp.float32),
        'aa': (jax.random.uniform(ks[5], (N_A, N_A)) < 0.5).astype(jnp.float32),
    }
    # exercise the zero-in-degree path (that etype contributes 0 for this node)
    adjs['aa'] = adjs['aa'].at[0, :].set(0.0)

    # parameters (PyTorch Linear weights kept pre-transposed: (in, out))
    w1 = jax.random.normal(ks[6], (D, D), jnp.float32) / jnp.sqrt(D)   # Linear(D,D,bias=False)
    gamma = jnp.ones((1, D), jnp.float32)                              # BatchNorm1d weight
    beta = jnp.zeros((1, D), jnp.float32)                              # BatchNorm1d bias
    w2 = jax.random.normal(ks[7], (D, D), jnp.float32) / jnp.sqrt(D)   # Linear(D,D)
    b2 = 0.01 * jax.random.normal(ks[8], (1, D), jnp.float32)

    # one-time graph preprocessing, parameter lane padding, feature packing
    graph, meta = preprocess_graph(adjs, N_A, N_B, D)
    params = pack_params(w1, gamma, beta, w2, b2, meta)
    feat_packed = pack_feats({'A': feat_A, 'B': feat_B}, meta)

    fwd = jax.jit(functools.partial(gcn_node_forward, meta=meta,
                                    edge_dict=edge_dict))
    out_packed = fwd(graph, feat_packed, emb, params)
    out_packed = jax.block_until_ready(out_packed)
    out = unpack_feats(out_packed, meta)

    assert out['A'].shape == (N_A, D) and out['B'].shape == (N_B, D)

    # bf16 MXU operands (adjacency with folded 1/deg, features, k, hr, W1, W2)
    # give ~1e-2-level drift vs this all-f32 reference; tolerance reflects that.
    ref = gcn_node_reference({'A': feat_A, 'B': feat_B}, adjs, emb, edge_dict,
                             (w1, gamma, beta, w2, b2))
    for nt_key in ('A', 'B'):
        assert jnp.allclose(out[nt_key], ref[nt_key], atol=5e-2, rtol=5e-2), (
            f"mismatch for node type {nt_key}")

    print("KERNEL_OK")
</pallas_src>

<mosaic_0001>
module attributes {stable_mosaic.version = 11 : i64} {
  func.func @_bn_mlp_res_kernel(%arg0: i32, %arg1: memref<16x128xf32, #tpu.memory_space<vmem>>, %arg2: memref<8x128xf32, #tpu.memory_space<vmem>>, %arg3: memref<8x128xf32, #tpu.memory_space<vmem>>, %arg4: memref<6x128xf32, #tpu.memory_space<vmem>>, %arg5: memref<128x128xbf16, #tpu.memory_space<vmem>>, %arg6: memref<8x128xf32, #tpu.memory_space<vmem>>) attributes {dimension_semantics = [#tpu.dimension_semantics<parallel>], iteration_bounds = array<i64: 2>, scalar_prefetch = 0 : i64, scratch_operands = 0 : i64, tpu.core_type = #tpu.core_type<tc>, window_params = [{pipeline_mode = #tpu.pipeline_mode<synchronous>, transform_indices = @transform_0, window_bounds = array<i64: 16, 128>}, {transform_indices = @transform_1, window_bounds = array<i64: 8, 128>}, {transform_indices = @transform_2, window_bounds = array<i64: 8, 128>}, {pipeline_mode = #tpu.pipeline_mode<synchronous>, transform_indices = @transform_3, window_bounds = array<i64: 6, 128>}, {pipeline_mode = #tpu.pipeline_mode<synchronous>, transform_indices = @transform_4, window_bounds = array<i64: 128, 128>}, {transform_indices = @transform_5, window_bounds = array<i64: 8, 128>}]} {
    %c3 = arith.constant 3 : index
    %c0 = arith.constant 0 : index
    %0 = vector.load %arg4[%c3, %c0] : memref<6x128xf32, #tpu.memory_space<vmem>>, vector<1x128xf32>
    %c4 = arith.constant 4 : index
    %c0_0 = arith.constant 0 : index
    %1 = vector.load %arg4[%c4, %c0_0] : memref<6x128xf32, #tpu.memory_space<vmem>>, vector<1x128xf32>
    %c5 = arith.constant 5 : index
    %c0_1 = arith.constant 0 : index
    %2 = vector.load %arg4[%c5, %c0_1] : memref<6x128xf32, #tpu.memory_space<vmem>>, vector<1x128xf32>
    %c0_2 = arith.constant 0 : index
    %c0_3 = arith.constant 0 : index
    %3 = vector.load %arg1[%c0_2, %c0_3] : memref<16x128xf32, #tpu.memory_space<vmem>>, vector<16x128xf32>
    %4 = tpu.iota {dimensions = array<i32: 0>} : vector<16x128xi32>
    %c8_i32 = arith.constant 8 : i32
    %c0_i32 = arith.constant 0 : i32
    %5 = arith.cmpi eq, %c8_i32, %c0_i32 : i32
    %c1_i32 = arith.constant 1 : i32
    %6 = arith.select %5, %c1_i32, %c8_i32 : i32
    %7 = vector.broadcast %6 : i32 to vector<16x128xi32>
    %8 = arith.remsi %4, %7 : vector<16x128xi32>
    %c0_i32_4 = arith.constant 0 : i32
    %9 = vector.broadcast %c0_i32_4 : i32 to vector<16x128xi32>
    %10 = arith.cmpi ne, %8, %9 : vector<16x128xi32>
    %c0_i32_5 = arith.constant 0 : i32
    %11 = vector.broadcast %c0_i32_5 : i32 to vector<16x128xi32>
    %12 = arith.cmpi slt, %8, %11 : vector<16x128xi32>
    %c0_i32_6 = arith.constant 0 : i32
    %13 = arith.cmpi slt, %6, %c0_i32_6 : i32
    %14 = vector.broadcast %13 : i1 to vector<16x128xi1>
    %15 = vector.broadcast %14 : vector<16x128xi1> to vector<16x128xi1>
    %16 = arith.xori %12, %15 : vector<16x128xi1>
    %17 = arith.andi %16, %10 : vector<16x128xi1>
    %18 = vector.broadcast %6 : i32 to vector<16x128xi32>
    %19 = arith.addi %8, %18 : vector<16x128xi32>
    %20 = arith.select %17, %19, %8 : vector<16x128xi1>, vector<16x128xi32>
    %c0_i32_7 = arith.constant 0 : i32
    %21 = vector.broadcast %c0_i32_7 : i32 to vector<16x128xi32>
    %22 = arith.cmpi eq, %20, %21 : vector<16x128xi32>
    %cst = arith.constant 0.000000e+00 : f32
    %23 = vector.broadcast %cst : f32 to vector<16x128xf32>
    %24 = arith.select %22, %3, %23 : vector<16x128xi1>, vector<16x128xf32>
    %cst_8 = arith.constant dense<0.000000e+00> : vector<128xf32>
    %25 = vector.multi_reduction <add>, %24, %cst_8 [0] : vector<16x128xf32> to vector<128xf32>
    %26 = vector.shape_cast %25 : vector<128xf32> to vector<1x128xf32>
    %c8_i32_9 = arith.constant 8 : i32
    %c0_i32_10 = arith.constant 0 : i32
    %27 = arith.cmpi eq, %c8_i32_9, %c0_i32_10 : i32
    %c1_i32_11 = arith.constant 1 : i32
    %28 = arith.select %27, %c1_i32_11, %c8_i32_9 : i32
    %29 = vector.broadcast %28 : i32 to vector<16x128xi32>
    %30 = arith.remsi %4, %29 : vector<16x128xi32>
    %c0_i32_12 = arith.constant 0 : i32
    %31 = vector.broadcast %c0_i32_12 : i32 to vector<16x128xi32>
    %32 = arith.cmpi ne, %30, %31 : vector<16x128xi32>
    %c0_i32_13 = arith.constant 0 : i32
    %33 = vector.broadcast %c0_i32_13 : i32 to vector<16x128xi32>
    %34 = arith.cmpi slt, %30, %33 : vector<16x128xi32>
    %c0_i32_14 = arith.constant 0 : i32
    %35 = arith.cmpi slt, %28, %c0_i32_14 : i32
    %36 = vector.broadcast %35 : i1 to vector<16x128xi1>
    %37 = vector.broadcast %36 : vector<16x128xi1> to vector<16x128xi1>
    %38 = arith.xori %34, %37 : vector<16x128xi1>
    %39 = arith.andi %38, %32 : vector<16x128xi1>
    %40 = vector.broadcast %28 : i32 to vector<16x128xi32>
    %41 = arith.addi %30, %40 : vector<16x128xi32>
    %42 = arith.select %39, %41, %30 : vector<16x128xi1>, vector<16x128xi32>
    %c1_i32_15 = arith.constant 1 : i32
    %43 = vector.broadcast %c1_i32_15 : i32 to vector<16x128xi32>
    %44 = arith.cmpi eq, %42, %43 : vector<16x128xi32>
    %cst_16 = arith.constant 0.000000e+00 : f32
    %45 = vector.broadcast %cst_16 : f32 to vector<16x128xf32>
    %46 = arith.select %44, %3, %45 : vector<16x128xi1>, vector<16x128xf32>
    %cst_17 = arith.constant dense<0.000000e+00> : vector<128xf32>
    %47 = vector.multi_reduction <add>, %46, %cst_17 [0] : vector<16x128xf32> to vector<128xf32>
    %48 = vector.shape_cast %47 : vector<128xf32> to vector<1x128xf32>
    %cst_18 = arith.constant 0.0714285746 : f32
    %49 = vector.broadcast %cst_18 : f32 to vector<1x128xf32>
    %50 = arith.mulf %26, %49 : vector<1x128xf32>
    %cst_19 = arith.constant 0.0714285746 : f32
    %51 = vector.broadcast %cst_19 : f32 to vector<1x128xf32>
    %52 = arith.mulf %48, %51 : vector<1x128xf32>
    %53 = arith.mulf %50, %50 : vector<1x128xf32>
    %54 = arith.subf %52, %53 : vector<1x128xf32>
    %cst_20 = arith.constant 0.000000e+00 : f32
    %55 = vector.broadcast %cst_20 : f32 to vector<1x128xf32>
    %56 = arith.maximumf %54, %55 : vector<1x128xf32>
    %cst_21 = arith.constant 9.99999974E-6 : f32
    %57 = vector.broadcast %cst_21 : f32 to vector<1x128xf32>
    %58 = arith.addf %56, %57 : vector<1x128xf32>
    %59 = math.rsqrt %58 : vector<1x128xf32>
    %60 = arith.mulf %59, %0 : vector<1x128xf32>
    %61 = arith.mulf %50, %60 : vector<1x128xf32>
    %62 = arith.subf %1, %61 : vector<1x128xf32>
    %c0_22 = arith.constant 0 : index
    %c0_23 = arith.constant 0 : index
    %63 = vector.load %arg2[%c0_22, %c0_23] : memref<8x128xf32, #tpu.memory_space<vmem>>, vector<8x128xf32>
    %64 = vector.broadcast %60 : vector<1x128xf32> to vector<8x128xf32>
    %65 = arith.mulf %63, %64 : vector<8x128xf32>
    %66 = vector.broadcast %62 : vector<1x128xf32> to vector<8x128xf32>
    %67 = arith.addf %65, %66 : vector<8x128xf32>
    %cst_24 = arith.constant 0.000000e+00 : f32
    %68 = vector.broadcast %cst_24 : f32 to vector<8x128xf32>
    %69 = arith.maximumf %67, %68 : vector<8x128xf32>
    %70 = arith.truncf %69 : vector<8x128xf32> to vector<8x128xbf16>
    %c0_25 = arith.constant 0 : index
    %c0_26 = arith.constant 0 : index
    %71 = vector.load %arg5[%c0_25, %c0_26] : memref<128x128xbf16, #tpu.memory_space<vmem>>, vector<128x128xbf16>
    %cst_27 = arith.constant dense<0.000000e+00> : vector<8x128xf32>
    %72 = tpu.matmul %70, %71, %cst_27 {dimension_numbers = #tpu.dot_dimension_numbers<[1], [0], [0], [1], [0, 0, 1, 1], [], []>} : vector<8x128xbf16>, vector<128x128xbf16>, vector<8x128xf32> -> vector<8x128xf32>
    %73 = vector.broadcast %2 : vector<1x128xf32> to vector<8x128xf32>
    %74 = arith.addf %72, %73 : vector<8x128xf32>
    %c0_28 = arith.constant 0 : index
    %c0_29 = arith.constant 0 : index
    %75 = vector.load %arg3[%c0_28, %c0_29] : memref<8x128xf32, #tpu.memory_space<vmem>>, vector<8x128xf32>
    %76 = arith.addf %75, %74 : vector<8x128xf32>
    %c0_30 = arith.constant 0 : index
    %c0_31 = arith.constant 0 : index
    %77 = vector.load %arg6[%c0_30, %c0_31] : memref<8x128xf32, #tpu.memory_space<vmem>>, vector<8x128xf32>
    tpu.vector_store %arg6[%c0_30, %c0_31], %76 {strides = array<i32>} : memref<8x128xf32, #tpu.memory_space<vmem>>, vector<8x128xf32>,
    return
  }
  func.func @transform_0(%arg0: i32) -> (i32, i32) {
    %c0_i32 = arith.constant 0 : i32
    %c0_i32_0 = arith.constant 0 : i32
    %c0_i32_1 = arith.constant 0 : i32
    return %c0_i32, %c0_i32_0 : i32, i32
  }
  func.func @transform_1(%arg0: i32) -> (i32, i32) {
    %c0_i32 = arith.constant 0 : i32
    %c0_i32_0 = arith.constant 0 : i32
    return %arg0, %c0_i32 : i32, i32
  }
  func.func @transform_2(%arg0: i32) -> (i32, i32) {
    %c0_i32 = arith.constant 0 : i32
    %c0_i32_0 = arith.constant 0 : i32
    return %arg0, %c0_i32 : i32, i32
  }
  func.func @transform_3(%arg0: i32) -> (i32, i32) {
    %c0_i32 = arith.constant 0 : i32
    %c0_i32_0 = arith.constant 0 : i32
    %c0_i32_1 = arith.constant 0 : i32
    return %c0_i32, %c0_i32_0 : i32, i32
  }
  func.func @transform_4(%arg0: i32) -> (i32, i32) {
    %c0_i32 = arith.constant 0 : i32
    %c0_i32_0 = arith.constant 0 : i32
    %c0_i32_1 = arith.constant 0 : i32
    return %c0_i32, %c0_i32_0 : i32, i32
  }
  func.func @transform_5(%arg0: i32) -> (i32, i32) {
    %c0_i32 = arith.constant 0 : i32
    %c0_i32_0 = arith.constant 0 : i32
    return %arg0, %c0_i32 : i32, i32
  }
}

module attributes {stable_mosaic.version = 11 : i64} {
  func.func @_agg_h_kernel(%arg0: i32, %arg1: memref<8x1xf32, #tpu.memory_space<vmem>>, %arg2: memref<8x8xbf16, #tpu.memory_space<vmem>>, %arg3: memref<8x8xbf16, #tpu.memory_space<vmem>>, %arg4: memref<16x128xf32, #tpu.memory_space<vmem>>, %arg5: memref<6x128xf32, #tpu.memory_space<vmem>>, %arg6: memref<128x128xbf16, #tpu.memory_space<vmem>>, %arg7: memref<8x128xf32, #tpu.memory_space<vmem>>, %arg8: memref<8x128xf32, #tpu.memory_space<vmem>>) attributes {dimension_semantics = [#tpu.dimension_semantics<parallel>], iteration_bounds = array<i64: 2>, scalar_prefetch = 0 : i64, scratch_operands = 0 : i64, tpu.core_type = #tpu.core_type<tc>, window_params = [{transform_indices = @transform_0, window_bounds = array<i64: 8, 1>}, {transform_indices = @transform_1, window_bounds = array<i64: 8, 8>}, {transform_indices = @transform_2, window_bounds = array<i64: 8, 8>}, {pipeline_mode = #tpu.pipeline_mode<synchronous>, transform_indices = @transform_3, window_bounds = array<i64: 16, 128>}, {pipeline_mode = #tpu.pipeline_mode<synchronous>, transform_indices = @transform_4, window_bounds = array<i64: 6, 128>}, {pipeline_mode = #tpu.pipeline_mode<synchronous>, transform_indices = @transform_5, window_bounds = array<i64: 128, 128>}, {transform_indices = @transform_6, window_bounds = array<i64: 8, 128>}, {transform_indices = @transform_7, window_bounds = array<i64: 8, 128>}]} {
    %c0 = arith.constant 0 : index
    %c0_0 = arith.constant 0 : index
    %0 = vector.load %arg4[%c0, %c0_0] : memref<16x128xf32, #tpu.memory_space<vmem>>, vector<8x128xf32>
    %c8 = arith.constant 8 : index
    %c0_1 = arith.constant 0 : index
    %1 = vector.load %arg4[%c8, %c0_1] : memref<16x128xf32, #tpu.memory_space<vmem>>, vector<8x128xf32>
    %c1_i32 = arith.constant 1 : i32
    %2 = arith.cmpi slt, %arg0, %c1_i32 : i32
    %3 = arith.extui %2 : i1 to i32
    %4 = arith.sitofp %3 : i32 to f32
    %c0_2 = arith.constant 0 : index
    %c0_3 = arith.constant 0 : index
    %5 = vector.load %arg5[%c0_2, %c0_3] : memref<6x128xf32, #tpu.memory_space<vmem>>, vector<1x128xf32>
    %6 = vector.broadcast %4 : f32 to vector<1x128xf32>
    %7 = arith.mulf %6, %5 : vector<1x128xf32>
    %cst = arith.constant 1.000000e+00 : f32
    %8 = arith.subf %cst, %4 : f32
    %c2 = arith.constant 2 : index
    %c0_4 = arith.constant 0 : index
    %9 = vector.load %arg5[%c2, %c0_4] : memref<6x128xf32, #tpu.memory_space<vmem>>, vector<1x128xf32>
    %10 = vector.broadcast %8 : f32 to vector<1x128xf32>
    %11 = arith.mulf %10, %9 : vector<1x128xf32>
    %12 = arith.addf %7, %11 : vector<1x128xf32>
    %13 = vector.broadcast %12 : vector<1x128xf32> to vector<8x128xf32>
    %14 = arith.mulf %0, %13 : vector<8x128xf32>
    %15 = arith.truncf %14 : vector<8x128xf32> to vector<8x128xbf16>
    %c1 = arith.constant 1 : index
    %c0_5 = arith.constant 0 : index
    %16 = vector.load %arg5[%c1, %c0_5] : memref<6x128xf32, #tpu.memory_space<vmem>>, vector<1x128xf32>
    %17 = vector.broadcast %16 : vector<1x128xf32> to vector<8x128xf32>
    %18 = arith.mulf %1, %17 : vector<8x128xf32>
    %19 = arith.truncf %18 : vector<8x128xf32> to vector<8x128xbf16>
    %c0_6 = arith.constant 0 : index
    %c0_7 = arith.constant 0 : index
    %20 = vector.load %arg2[%c0_6, %c0_7] : memref<8x8xbf16, #tpu.memory_space<vmem>>, vector<8x8xbf16>
    %cst_8 = arith.constant dense<0.000000e+00> : vector<8x128xf32>
    %21 = tpu.matmul %20, %15, %cst_8 {dimension_numbers = #tpu.dot_dimension_numbers<[1], [0], [0], [1], [0, 0, 1, 1], [], []>} : vector<8x8xbf16>, vector<8x128xbf16>, vector<8x128xf32> -> vector<8x128xf32>
    %c0_9 = arith.constant 0 : index
    %c0_10 = arith.constant 0 : index
    %22 = vector.load %arg3[%c0_9, %c0_10] : memref<8x8xbf16, #tpu.memory_space<vmem>>, vector<8x8xbf16>
    %cst_11 = arith.constant dense<0.000000e+00> : vector<8x128xf32>
    %23 = tpu.matmul %22, %19, %cst_11 {dimension_numbers = #tpu.dot_dimension_numbers<[1], [0], [0], [1], [0, 0, 1, 1], [], []>} : vector<8x8xbf16>, vector<8x128xbf16>, vector<8x128xf32> -> vector<8x128xf32>
    %24 = arith.addf %21, %23 : vector<8x128xf32>
    %c8_i32 = arith.constant 8 : i32
    %25 = arith.muli %arg0, %c8_i32 : i32
    %26 = tpu.assume_multiple %25, 8 : i32
    %27 = arith.index_cast %26 : i32 to index
    %c0_12 = arith.constant 0 : index
    %28 = vector.load %arg4[%27, %c0_12] : memref<16x128xf32, #tpu.memory_space<vmem>>, vector<8x128xf32>
    %c0_13 = arith.constant 0 : index
    %c0_14 = arith.constant 0 : index
    %29 = vector.load %arg1[%c0_13, %c0_14] : memref<8x1xf32, #tpu.memory_space<vmem>>, vector<8x1xf32>
    %30 = vector.broadcast %29 : vector<8x1xf32> to vector<8x128xf32>
    %31 = arith.mulf %30, %28 : vector<8x128xf32>
    %32 = arith.subf %31, %24 : vector<8x128xf32>
    %33 = arith.truncf %32 : vector<8x128xf32> to vector<8x128xbf16>
    %c0_15 = arith.constant 0 : index
    %c0_16 = arith.constant 0 : index
    %34 = vector.load %arg6[%c0_15, %c0_16] : memref<128x128xbf16, #tpu.memory_space<vmem>>, vector<128x128xbf16>
    %cst_17 = arith.constant dense<0.000000e+00> : vector<8x128xf32>
    %35 = tpu.matmul %33, %34, %cst_17 {dimension_numbers = #tpu.dot_dimension_numbers<[1], [0], [0], [1], [0, 0, 1, 1], [], []>} : vector<8x128xbf16>, vector<128x128xbf16>, vector<8x128xf32> -> vector<8x128xf32>
    %c0_18 = arith.constant 0 : index
    %c0_19 = arith.constant 0 : index
    %36 = vector.load %arg7[%c0_18, %c0_19] : memref<8x128xf32, #tpu.memory_space<vmem>>, vector<8x128xf32>
    tpu.vector_store %arg7[%c0_18, %c0_19], %35 {strides = array<i32>} : memref<8x128xf32, #tpu.memory_space<vmem>>, vector<8x128xf32>,
    %cst_20 = arith.constant dense<0.000000e+00> : vector<128xf32>
    %37 = vector.multi_reduction <add>, %35, %cst_20 [0] : vector<8x128xf32> to vector<128xf32>
    %38 = vector.shape_cast %37 : vector<128xf32> to vector<1x128xf32>
    %39 = arith.mulf %35, %35 : vector<8x128xf32>
    %cst_21 = arith.constant dense<0.000000e+00> : vector<128xf32>
    %40 = vector.multi_reduction <add>, %39, %cst_21 [0] : vector<8x128xf32> to vector<128xf32>
    %41 = vector.shape_cast %40 : vector<128xf32> to vector<1x128xf32>
    %cst_22 = arith.constant 0.000000e+00 : f32
    %42 = vector.broadcast %cst_22 : f32 to vector<6x128xf32>
    %43 = tpu.concatenate %38, %41, %42 in 0 : vector<1x128xf32>, vector<1x128xf32>, vector<6x128xf32> -> vector<8x128xf32>
    %c0_23 = arith.constant 0 : index
    %c0_24 = arith.constant 0 : index
    %44 = vector.load %arg8[%c0_23, %c0_24] : memref<8x128xf32, #tpu.memory_space<vmem>>, vector<8x128xf32>
    tpu.vector_store %arg8[%c0_23, %c0_24], %43 {strides = array<i32>} : memref<8x128xf32, #tpu.memory_space<vmem>>, vector<8x128xf32>,
    return
  }
  func.func @transform_0(%arg0: i32) -> (i32, i32) {
    %c0_i32 = arith.constant 0 : i32
    %c0_i32_0 = arith.constant 0 : i32
    return %arg0, %c0_i32 : i32, i32
  }
  func.func @transform_1(%arg0: i32) -> (i32, i32) {
    %c0_i32 = arith.constant 0 : i32
    %c0_i32_0 = arith.constant 0 : i32
    return %arg0, %c0_i32 : i32, i32
  }
  func.func @transform_2(%arg0: i32) -> (i32, i32) {
    %c0_i32 = arith.constant 0 : i32
    %c0_i32_0 = arith.constant 0 : i32
    return %arg0, %c0_i32 : i32, i32
  }
  func.func @transform_3(%arg0: i32) -> (i32, i32) {
    %c0_i32 = arith.constant 0 : i32
    %c0_i32_0 = arith.constant 0 : i32
    %c0_i32_1 = arith.constant 0 : i32
    return %c0_i32, %c0_i32_0 : i32, i32
  }
  func.func @transform_4(%arg0: i32) -> (i32, i32) {
    %c0_i32 = arith.constant 0 : i32
    %c0_i32_0 = arith.constant 0 : i32
    %c0_i32_1 = arith.constant 0 : i32
    return %c0_i32, %c0_i32_0 : i32, i32
  }
  func.func @transform_5(%arg0: i32) -> (i32, i32) {
    %c0_i32 = arith.constant 0 : i32
    %c0_i32_0 = arith.constant 0 : i32
    %c0_i32_1 = arith.constant 0 : i32
    return %c0_i32, %c0_i32_0 : i32, i32
  }
  func.func @transform_6(%arg0: i32) -> (i32, i32) {
    %c0_i32 = arith.constant 0 : i32
    %c0_i32_0 = arith.constant 0 : i32
    return %arg0, %c0_i32 : i32, i32
  }
  func.func @transform_7(%arg0: i32) -> (i32, i32) {
    %c0_i32 = arith.constant 0 : i32
    %c0_i32_0 = arith.constant 0 : i32
    return %arg0, %c0_i32 : i32, i32
  }
}

</mosaic_0001>

<bundles_post_ra>
// kernel: gcn_node_forward.3
= control target key start
LH: loop header
LB: loop body
LE: loop exit
PB: predicated region body
PF: predicated region fallthrough
CT: control target
= control target key end

     0   :  { %10 = vsyncpa [#allocation3], 0  ;;  %s1006_s0 = inlined_call_operand.vmem [shape: f32[16,128], index: 0, kind: input, shape index: {}]   ;;  %s1007_s1 = inlined_call_operand.vmem [shape: f32[16,128], index: 1, kind: input, shape index: {}]   ;;  %s1008_s2 = inlined_call_operand.hbm [shape: f32[16,128], index: 2, kind: input, shape index: {}, may-alias: {2,5}]   ;;  %s1009_s3 = inlined_call_operand.vmem [shape: f32[6,128], index: 3, kind: input, shape index: {}]   ;;  %s1010_s4 = inlined_call_operand.vmem [shape: bf16[128,128], index: 4, kind: input, shape index: {}]   ;;  %s1011_s5 = inlined_call_operand.hbm [shape: f32[16,128], index: 5, kind: output, shape index: {}, may-alias: {2,5}]  }
   0x1   :  { %12 = vsyncpa [#allocation3 + $0x1], 0 }
   0x2   :  { %13 = vsyncpa [#allocation4], 0 }
   0x3   :  { %15 = vsyncpa [#allocation4 + $0x1], 0  ;;  %s783_s18 = smov 0   ;;  %s785_s19 = smov 0  }
   0x4   :  { %s787_s20 = smov 0   ;;  %s789_s21 = smov 0  }
   0x5 LB: > { %s804_s22 = sadd.s32 4294967295, %s747_s21   ;;  %s542_s23 = sadd.s32 4294967294, %s747_s21   ;;  %s747_s21 = sphi %s789_s21, %s1028_s21   ;;  %s743_s20 = sphi %s787_s20, %s1027_s20   ;;  %s739_s19 = sphi %s785_s19, %s1026_s19   ;;  %s735_s18 = sphi %s783_s18, %s1025_s18  }
   0x6   : > { %s808_s24 = sadd.s32 1, %s747_s21   ;;  %s75_s25 = sadd.s32 1, %s743_s20 }
   0x7   : > { %s72_s26 = ssub.s32 %s747_s21, %s808_s24  ;;  %p82_p0 = scmp.ne.s32.totalorder %s743_s20, %s739_s19 }
   0x8   : > { %p73_p1 = scmp.eq.s32.totalorder %s72_s26, 0  ;;  %p83_p2 = scmp.eq.s32.totalorder %s747_s21, 0 }
   0x9   : > { %p88_p3 = scmp.ne.s32.totalorder %s739_s19, %s735_s18  ;;  %p89_p4 = scmp.eq.s32.totalorder %s804_s22, 0 }
   0xa   : > { %s820_s27 = scalar_select %p73_p1, %s743_s20, %s75_s25  }
   0xb   : > { %p822_p5 = por %p83_p2, %p82_p0  ;;  %p826_p6 = por %p89_p4, %p88_p3 }
   0xc   : > { %p154_p7 = scmp.eq.s32.totalorder %s804_s22, 1  ;;  %p160_p8 = scmp.eq.s32.totalorder %s542_s23, 1 }
   0xd   : > { %p605_p10 = scmp.lt.s32.totalorder %s747_s21, 2  ;;  %s196_s7 = sand.u32 1, %s743_s20  }
   0xe   : > { %p833_p11 = por %p154_p7, %p82_p0  ;;  %p837_p12 = por %p160_p8, %p88_p3 }
   0xf   : > { %s546_s8 = sshll.u32 %s747_s21, 7  ;;  %s545_s9 = sshll.u32 %s196_s7, 3 }
  0x10   : > { %s1015_s30 = scalar_select %p833_p11, 1, 0 }
  0x11   : > { %s1016_s6 = scalar_select %p837_p12, 1, 0 }
  0x12   : > { %s846_s12 = scalar_lea.hbm %s1008_s2, %s546_s8  ;;  %s200_s13 = scalar_lea.vmem [#allocation2], %s545_s9 }
  0x13   : > { %s207_s14 = sshll.u32 %s200_s13, 4  ;;  %p850_p13 = pnand %p605_p10, %p822_p5  ;;  %s854_s14 = int_to_ptr.vmem [resolvable:$true] %s207_s14 }
  0x14   : > { %s197_s16 = scalar_lea.sflag [#allocation3], %s196_s7  ;;  %s651_s17 = scalar_lea.hbm %s846_s12, 128 }
  0x15   : > { %p652_p2 = scmp.ne.s32.totalorder %s846_s12, %s651_s17  ;;  %p653_p3 = pneg %p850_p13 }
  0x16   : > { %s656_s26 = scalar_lea.hbm %s1008_s2, 256  ;;  %p657_p5 = scmp.lt.u32.totalorder %s846_s12, %s1008_s2 }
  0x17   : > { %p654_p4 = pnand %p653_p3, %p652_p2  ;;  %p658_p8 = scmp.lt.u32.totalorder %s656_s26, %s651_s17 }
  0x18   : > { %p660_p9 = scmp.lt.u32.totalorder %s651_s17, %s846_s12 }
  0x19   : > { %p655_p7 = pneg %p654_p4  ;;  %p659_p10 = por %p658_p8, %p657_p5 }
  0x1b   : > { %p661_p0 = por %p660_p9, %p659_p10 }
  0x1d   : > { %p662_p1 = pnand %p661_p0, %p655_p7 }
  0x1f   : > { %665 = shalt.err (!%p662_p1)
}
  0x20   : > { %s666_s7 = scalar_lea.vmem %s854_s14, 128  ;;  %s749_s9 = smov [#allocation2]  }
  0x21   : > { %p667_p2 = scmp.ne.s32.totalorder %s854_s14, %s666_s7  ;;  %s671_s10 = sshll.u32 %s749_s9, 4  ;;  %s672_s10 = int_to_ptr.vmem [resolvable:$false] %s671_s10 }
  0x22   : > { %s673_s11 = scalar_lea.vmem %s672_s10, 256  ;;  %p674_p11 = scmp.lt.s32.totalorder %s854_s14, %s672_s10 }
  0x23   : > { %p669_p4 = pnand %p667_p2, %p653_p3  ;;  %p675_p5 = scmp.lt.s32.totalorder %s673_s11, %s666_s7 }
  0x25   : > { %p670_p12 = pneg %p669_p4  ;;  %p676_p8 = por %p675_p5, %p674_p11 }
  0x27   : > { %p677_p9 = pnand %p676_p8, %p670_p12 }
  0x29   : > { %680 = shalt.err (!%p677_p9)
}
  0x2a   : > { %600 = dma.hbm_to_vmem [thread:$0]  (!%p850_p13), %s846_s12, 128, %s854_s14, %s197_s16  }
  0x2b   : > { %p1018_p0 = scmp.lt.s32.totalorder %s747_s21, 3  ;;  %p1019_p1 = scmp.ge.s32.totalorder %s747_s21, 1 }
  0x2d   : > { %p213_p3 = pnand %p1019_p1, %p1018_p0 }
  0x2e   : > { %s888_s13 = sand.u32 (!%p213_p3), 1, %s739_s19  }
  0x2f   : > { %216 = sbr.rel (%p213_p3) target bundleno = 344 (0x158), region = 40  ;;  %s548_s17 = sshll.u32 (!%p213_p3), %s888_s13, 3 }
  0x30   : > { %s219_s23 = scalar_lea.sflag (!%p213_p3), [#allocation3], %s888_s13  ;;  %s894_s15 = scalar_lea.vmem (!%p213_p3), [#allocation2], %s548_s17 }
  0x36   : > { %726 = dma.done.wait (%p826_p6), %s219_s23, 128  }
  0x37   : > { %728 = vsyncadd (%p826_p6), %s219_s23, 4294967168  ;;  %v263_v0 = vlaneseq  ;;  %v750_v1 = vmov 0.0   ;;  %vm751_vm0 = vmmov 0   ;;  %v641_v4 = vld [vmem:[%s1010_s4] sm:$0xff]   ;;  %v642_v6 = vld [vmem:[%s1010_s4 + $0x8] sm:$0xff]   ;;  %p253_p6 = scmp.lt.s32.totalorder %s804_s22, 1 }
  0x38   : > { %573 = vmatprep.subr.bf16.mxu0 %v750_v1  ;;  %589 = vmatprep.mubr.msk.bf16.mxu0 %vm751_vm0, %v750_v1  ;;  %v643_v9 = vld [vmem:[%s1010_s4 + $0x10] sm:$0xff]   ;;  %v261_v10 = vld [vmem:[%s1006_s0] sm:$0xff]  ;;  %v262_v11 = vld [vmem:[%s1006_s0 + $0x8] sm:$0xff]  ;;  %s561_s26 = sshll.u32 %s804_s22, 7  ;;  %s252_s28 = scalar_lea.vmem [#allocation5], %s548_s17 }
  0x39   : > { %v900_v2 = vshrl.u32 %v263_v0, 7  ;;  %574 = vmatpush3.bf16.msra.mxu0 %v641_v4  ;;  %v644_v14 = vld [vmem:[%s1010_s4 + $0x18] sm:$0xff]   ;;  %v645_v21 = vld [vmem:[%s1010_s4 + $0x20] sm:$0xff]   ;;  %v646_v26 = vld [vmem:[%s1010_s4 + $0x28] sm:$0xff]   ;;  %s254_s8 = scalar_select %p253_p6, %s804_s22, 1 }
  0x3a   : > { %575 = vmatprep.subr.bf16.mxu0 %v750_v1  ;;  %v647_v31 = vld [vmem:[%s1010_s4 + $0x30] sm:$0xff]   ;;  %v648_v36 = vld [vmem:[%s1010_s4 + $0x38] sm:$0xff]   ;;  %v258_v41 = vld [vmem:[%s1009_s3 + $0x3] sm:$0x1]  ;;  %s962_s10 = scalar_lea.hbm %s1011_s5, %s561_s26  ;;  %s447_s22 = scalar_lea.sflag [#allocation4], %s888_s13 }
  0x3b   : > { %v265_v3 = vadd.s32 8, %v900_v2  ;;  %v270_v5 = vand.u32 7, %v900_v2  ;;  %s550_s7 = sshll.u32 %s254_s8, 3  ;;  %v325_v42 = vsub.s32 0, %v900_v2  ;;  %v259_v45 = vld [vmem:[%s1009_s3 + $0x4] sm:$0x1] }
  0x3c   : > { %s256_s12 = scalar_lea.vmem %s1007_s1, %s550_s7  ;;  %v551_v55 = vld [vmem:[%s1009_s3 + $0x5] ss:$0 sm:$0xff]  ;;  %s460_s8 = sshll.u32 %s252_s28, 4  ;;  %s964_s8 = int_to_ptr.vmem [resolvable:$true] %s460_s8 }
  0x3d   : > { %v277_v7 = vand.u32 7, %v265_v3  ;;  %vm910_vm1 = vcmp.eq.s32.totalorder %v270_v5, 0  ;;  %576 = vmatpush3.bf16.msra.mxu0 %v642_v6  ;;  %vm301_vm2 = vcmp.eq.s32.totalorder %v270_v5, 1  ;;  %v322_v46 = vld [vmem:[%s256_s12] sm:$0xff]  ;;  %p1022_p12 = scmp.ne.s32.totalorder %s1015_s30, 0  ;;  %s752_s17 = smov [#allocation5]  }
  0x3e   : > { %577 = vmatprep.subr.bf16.mxu0 %v750_v1  ;;  %v292_v12 = vsel %vm910_vm1, %v261_v10, 0.0  ;;  %v303_v13 = vsel %vm301_vm2, %v261_v10, 0.0  ;;  %v443_v57 = vld [vmem:[%s894_s15] sm:$0xff]  ;;  %s681_s15 = scalar_lea.vmem %s964_s8, 128  ;;  %s685_s11 = sshll.u32 %s752_s17, 4  ;;  %s686_s11 = int_to_ptr.vmem [resolvable:$false] %s685_s11 }
  0x3f   : > { %vm291_vm3 = vcmp.eq.s32.totalorder %v277_v7, 0  ;;  %vm302_vm4 = vcmp.eq.s32.totalorder %v277_v7, 1  ;;  %p682_p11 = scmp.ne.s32.totalorder %s964_s8, %s681_s15  ;;  %s687_s23 = scalar_lea.vmem %s686_s11, 256 }
  0x40   : > { %v293_v15 = vsel %vm291_vm3, %v262_v11, 0.0  ;;  %v304_v16 = vsel %vm302_vm4, %v262_v11, 0.0  ;;  %p688_p10 = scmp.lt.s32.totalorder %s964_s8, %s686_s11  ;;  %p689_p2 = scmp.lt.s32.totalorder %s687_s23, %s681_s15 }
  0x41   : > { %578 = vmatpush3.bf16.msra.mxu0 %v643_v9  ;;  %v294_v17 = vadd.f32 %v293_v15, %v292_v12  ;;  %v305_v18 = vadd.f32 %v304_v16, %v303_v13  ;;  %p683_p13 = pnand %p682_p11, %p1022_p12 }
  0x42   : > { %579 = vmatprep.subr.bf16.mxu0 %v750_v1  ;;  %p690_p4 = por %p689_p2, %p688_p10 }
  0x43   : > { %v295_v19 = vrot.slane %v294_v17, 4  ;;  %v306_v20 = vrot.slane %v305_v18, 4  ;;  %p684_p7 = pneg %p683_p13 }
  0x45   : > { %580 = vmatpush3.bf16.msra.mxu0 %v644_v14  ;;  %v296_v22 = vadd.f32 %v295_v19, %v294_v17  ;;  %v307_v23 = vadd.f32 %v306_v20, %v305_v18  ;;  %p691_p5 = pnand %p690_p4, %p684_p7 }
  0x46   : > { %581 = vmatprep.subr.bf16.mxu0 %v750_v1 }
  0x47   : > { %v297_v24 = vrot.slane %v296_v22, 2  ;;  %v308_v25 = vrot.slane %v307_v23, 2 }
  0x49   : > { %582 = vmatpush3.bf16.msra.mxu0 %v645_v21  ;;  %v298_v27 = vadd.f32 %v297_v24, %v296_v22  ;;  %v309_v28 = vadd.f32 %v308_v25, %v307_v23 }
  0x4a   : > { %583 = vmatprep.subr.bf16.mxu0 %v750_v1 }
  0x4b   : > { %v299_v29 = vrot.slane %v298_v27, 1  ;;  %v310_v30 = vrot.slane %v309_v28, 1 }
  0x4d   : > { %584 = vmatpush3.bf16.msra.mxu0 %v646_v26  ;;  %v300_v32 = vadd.f32 %v299_v29, %v298_v27  ;;  %v311_v33 = vadd.f32 %v310_v30, %v309_v28 }
  0x4e   : > { %585 = vmatprep.subr.bf16.mxu0 %v750_v1 }
  0x4f   : > { %v312_v34 = vmul.f32 0.071428575, %v300_v32  ;;  %v313_v35 = vmul.f32 0.071428575, %v311_v33 }
  0x51   : > { %586 = vmatpush3.bf16.msra.mxu0 %v647_v31  ;;  %v314_v37 = vmul.f32 %v312_v34, %v312_v34 }
  0x52   : > { %587 = vmatprep.subr.bf16.mxu0 %v750_v1 }
  0x53   : > { %v315_v38 = vsub.f32 %v313_v35, %v314_v37 }
  0x55   : > { %588 = vmatpush3.bf16.msra.mxu0 %v648_v36  ;;  %v316_v39 = vmax.f32 %v315_v38, 0.0 }
  0x57   : > { %v317_v40 = vadd.f32 1e-05, %v316_v39 }
  0x59   : > { %649 = vrsqrt.f32 %v317_v40 }
  0x63   : > { %v650_v43 = vpop.eup %649 }
  0x64   : > { %v319_v44 = vmul.f32 %v650_v43, %v258_v41 }
  0x66   : > { %v320_v47 = vmul.f32 %v319_v44, %v312_v34  ;;  %v326_v48 = vrot.slane %v319_v44, %v325_v42 }
  0x68   : > { %v321_v49 = vsub.f32 %v259_v45, %v320_v47  ;;  %v327_v50 = vmul.f32 %v326_v48, %v322_v46 }
  0x6a   : > { %v331_v51 = vrot.slane %v321_v49, %v325_v42 }
  0x6c   : > { %v332_v52 = vadd.f32 %v331_v51, %v327_v50 }
  0x6e   : > { %v333_v53 = vmax.f32 %v332_v52, 0.0 }
  0x70   : > { %v334_v54 = vpack.c.bf16 %v333_v53, %v333_v53 }
  0x72   : > { %590 = vmatmul.mubr.bf16.vlgmr.msra.gmra.mrb[0].mxu0 %v334_v54 }
 0x145   : > { %v437_v56 = vpop.f32.mrb[0].mxu0 }
 0x146   : > { %v438_v58 = vadd.f32 %v551_v55, %v437_v56  ;;  %v591_v59 = vpop.f32.mrb[1].mxu0 }
 0x147   : > { %v440_v60 = vpop.f32.mrb[2].mxu0 }
 0x148   : > { %v444_v61 = vadd.f32 %v443_v57, %v438_v58  ;;  %v592_v62 = vpop.f32.mrb[3].mxu0 }
 0x14a   : > { %445 = vst [vmem:[%s252_s28] sm:$0xff] %v444_v61 }
 0x14b   : > { %694 = shalt.err (!%p691_p5)
}
 0x14c   : > { %s695_s13 = scalar_lea.hbm %s962_s10, 128  ;;  %s699_s16 = scalar_lea.hbm %s1011_s5, 256 }
 0x14d   : > { %p696_p8 = scmp.ne.s32.totalorder %s962_s10, %s695_s13  ;;  %p700_p1 = scmp.lt.u32.totalorder %s962_s10, %s1011_s5 }
 0x14e   : > { %p701_p3 = scmp.lt.u32.totalorder %s699_s16, %s695_s13  ;;  %p703_p11 = scmp.lt.u32.totalorder %s695_s13, %s962_s10 }
 0x14f   : > { %p697_p9 = pnand %p696_p8, %p1022_p12 }
 0x150   : > { %p702_p6 = por %p701_p3, %p700_p1 }
 0x151   : > { %p698_p0 = pneg %p697_p9 }
 0x152   : > { %p704_p13 = por %p703_p11, %p702_p6 }
 0x154   : > { %p705_p7 = pnand %p704_p13, %p698_p0 }
 0x156   : > { %708 = shalt.err (!%p705_p7)
}
 0x157   : > { %595 = dma.vmem_to_hbm [thread:$0]  (%p1022_p12), %s964_s8, 128, %s962_s10, %s447_s22  }
 0x158 PF: > { %s472_s26 = sand.u32 1, %s735_s18   ;;  %p1023_p10 = scmp.ne.s32.totalorder %s1016_s6, 0 }
 0x159   : > { %p1024_p2 = scmp.ge.s32.totalorder %s747_s21, 2  ;;  %s473_s28 = scalar_lea.sflag [#allocation4], %s472_s26 }
 0x15b   : > { %p602_p4 = pnand %p1024_p2, %p1023_p10 }
 0x15d   : > { %730 = dma.done.wait (!%p602_p4), %s473_s28, 128  }
 0x15e   : > { %732 = vsyncadd (!%p602_p4), %s473_s28, 4294967168  ;;  %p18_p5 = scmp.ge.s32.totalorder %s808_s24, 4   ;;  %s1025_s18 = smov %s739_s19 }
 0x15f   : > { %s1026_s19 = smov %s743_s20  ;;  %s1027_s20 = smov %s820_s27 }
 0x160   : > { %s1028_s21 = smov %s808_s24  ;;  %20 = sbr.rel (!%p18_p5) target bundleno = 5 (0x5), region = 88 }
 0x167   :  { %478 = vsyncpa [#allocation3], 1 }
 0x168   :  { %480 = vsyncpa [#allocation3 + $0x1], 1 }
 0x169   :  { %481 = vsyncpa [#allocation4], 1 }
 0x16a   :  { %483 = vsyncpa [#allocation4 + $0x1], 1 }

// kernel: gcn_node_forward.2
= control target key start
LH: loop header
LB: loop body
LE: loop exit
PB: predicated region body
PF: predicated region fallthrough
CT: control target
= control target key end

     0   :  { %s831_s24 = smov 0   ;;  %s941_s0 = inlined_call_operand.vmem [shape: f32[16,1], index: 0, kind: input, shape index: {}]   ;;  %s942_s1 = inlined_call_operand.vmem [shape: bf16[16,8], index: 1, kind: input, shape index: {}]   ;;  %s943_s2 = inlined_call_operand.vmem [shape: bf16[16,8], index: 2, kind: input, shape index: {}]   ;;  %s944_s3 = inlined_call_operand.vmem [shape: f32[16,128], index: 3, kind: input, shape index: {}]   ;;  %s945_s4 = inlined_call_operand.vmem [shape: f32[6,128], index: 4, kind: input, shape index: {}]   ;;  %s946_s5 = inlined_call_operand.vmem [shape: bf16[128,128], index: 5, kind: input, shape index: {}]   ;;  %s947_s6 = inlined_call_operand.vmem [shape: f32[16,128], index: 6, kind: output, shape index: {0}]   ;;  %s948_s7 = inlined_call_operand.vmem [shape: f32[16,128], index: 7, kind: output, shape index: {1}]  }
   0x1 LB: > { %s837_s25 = sadd.s32 4294967295, %s786_s24   ;;  %p691_p0 = scmp.ge.s32.totalorder %s786_s24, 1  ;;  %s786_s24 = sphi %s831_s24, %s18_s24  }
   0x2   : > { %p257_p1 = scmp.lt.s32.totalorder %s786_s24, 3 }
   0x4   : > { %p258_p2 = pnand %p691_p0, %p257_p1 }
   0x5   : > { %p299_p3 = scmp.lt.s32.totalorder (!%p258_p2), %s837_s25, 1  ;;  %v321_v0 = vld [vmem:[%s944_s3 + $0x8] sm:$0xff] (!%p258_p2)  ;;  %v333_v1 = vlaneseq (!%p258_p2)  ;;  %v788_v2 = vmov (!%p258_p2), 0.0   ;;  %v697_v3 = vld [vmem:[%s945_s4 + $0x1] ss:$0 sm:$0xff] (!%p258_p2)  ;;  %vm789_vm0 = vmmov (!%p258_p2), 0  }
   0x6   : > { %261 = sbr.rel (%p258_p2) target bundleno = 479 (0x1df), region = 44  ;;  %724 = vmatprep.subr.bf16.mxu0 (!%p258_p2), %v788_v2  ;;  %736 = vmatprep.subr.bf16.mxu1 (!%p258_p2), %v788_v2  ;;  %v325_v4 = vld [vmem:[%s945_s4] sm:$0x1] (!%p258_p2)  ;;  %v344_v5 = vmul.f32 (!%p258_p2), %v697_v3, %v321_v0  ;;  %vm352_vm1 = vcmask (!%p258_p2), 1043456   ;;  %v790_v7 = vmov (!%p258_p2), 0   ;;  %v773_v11 = vld [vmem:[%s946_s5 + $0x8] sm:$0xff] (!%p258_p2)  }
   0x7   : > { %726 = vmatprep.mubr.msk.bf16.mxu0 (!%p258_p2), %vm789_vm0, %v788_v2  ;;  %v772_v6 = vld [vmem:[%s946_s5] sm:$0xff] (!%p258_p2)   ;;  %752 = vmatprep.mubr.msk.bf16.mxu1 (!%p258_p2), %vm789_vm0, %v788_v2  ;;  %v334_v9 = vshrl.u32 (!%p258_p2), %v333_v1, 7  ;;  %vm348_vm2 = vcmask (!%p258_p2), 64512   ;;  %v774_v15 = vld [vmem:[%s946_s5 + $0x10] sm:$0xff] (!%p258_p2)   ;;  %v775_v23 = vld [vmem:[%s946_s5 + $0x18] sm:$0xff] (!%p258_p2)   ;;  %s700_s26 = sshll.u32 (!%p258_p2), %s837_s25, 3 }
   0x8   : > { %771 = vset.pattern.permute.xlu0 (!%p258_p2), %v790_v7  ;;  %v329_v8 = vld [vmem:[%s945_s4 + $0x2] sm:$0x1] (!%p258_p2)  ;;  %v345_v10 = vpack.c.bf16 (!%p258_p2), %v344_v5, %v344_v5  ;;  %737 = vmatpush3.bf16.msra.mxu1 (!%p258_p2), %v772_v6  ;;  %v777_v30 = vld [vmem:[%s946_s5 + $0x28] sm:$0xff] (!%p258_p2)   ;;  %v778_v31 = vld [vmem:[%s946_s5 + $0x30] sm:$0xff] (!%p258_p2)   ;;  %s443_s29 = scalar_lea.vmem (!%p258_p2), %s944_s3, %s700_s26  ;;  %vm572_vm3 = vcmask (!%p258_p2), 1040384   ;;  %vm574_vm4 = vcmask (!%p258_p2), 1041408  }
   0x9   : > { %738 = vmatprep.subr.bf16.mxu1 (!%p258_p2), %v788_v2  ;;  %v335_v20 = vsub.s32 (!%p258_p2), 0, %v334_v9  ;;  %v320_v22 = vld [vmem:[%s944_s3] sm:$0xff] (!%p258_p2)  ;;  %v779_v32 = vld [vmem:[%s946_s5 + $0x38] sm:$0xff] (!%p258_p2)  }
   0xa   : > { %v354_v13 = vsel (!%p258_p2), %vm352_vm1, %v345_v10, 0  ;;  %v776_v26 = vld [vmem:[%s946_s5 + $0x20] sm:$0xff] (!%p258_p2)  }
   0xb   : > { %725 = vmatpush3.bf16.msra.mxu0 (!%p258_p2), %v354_v13  ;;  %v444_v33 = vld [vmem:[%s443_s29] sm:$0xff] (!%p258_p2) }
   0xc   : > { %730 = vmatprep.subr.bf16.mxu0 (!%p258_p2), %v788_v2  ;;  %739 = vmatpush3.bf16.msra.mxu1 (!%p258_p2), %v773_v11 }
   0xd   : > { %s323_s30 = scalar_select %p299_p3, 1, 0  ;;  %740 = vmatprep.subr.bf16.mxu1 %v788_v2 }
   0xe   : > { %s865_s12 = scalar_select %p299_p3, %s837_s25, 1 }
   0xf   : > { %s324_s13 = scvt.s32.f32 %s323_s30 }
  0x10   : > { %s693_s18 = sshll.u32 %s865_s12, 2  ;;  %s875_s19 = sshll.u32 %s865_s12, 3  ;;  %741 = vmatpush3.bf16.msra.mxu1 %v774_v15 }
  0x11   : > { %v326_v12 = vstv %s324_s13  ;;  %s328_s20 = ssub.f32 1.0, %s324_s13  ;;  %s310_s23 = scalar_lea.vmem %s943_s2, %s693_s18  ;;  %742 = vmatprep.subr.bf16.mxu1 %v788_v2 }
  0x12   : > { %v327_v14 = vmul.f32 %v326_v12, %v325_v4  ;;  %s302_s28 = scalar_lea.vmem %s941_s0, %s875_s19  ;;  %v347_v17 = vld [vmem:[%s310_s23] sm:$0xf]  ;;  %s306_s17 = scalar_lea.vmem %s942_s1, %s693_s18 }
  0x13   : > { %v330_v16 = vstv %s328_s20  ;;  %v445_v18 = vld [vmem:[%s302_s28] sm:$0xff]  ;;  %727 = vmatmul.mubr.msk.bf16.vlgmr.msra.gmra.mrb[0].mxu0 %vm348_vm2, %v347_v17  ;;  %s314_s9 = scalar_lea.vmem %s947_s6, %s875_s19  ;;  %s318_s11 = scalar_lea.vmem %s948_s7, %s875_s19 }
  0x14   : > { %v331_v19 = vmul.f32 %v330_v16, %v329_v8  ;;  %448 = vperm.xlu0 %771, %v445_v18   ;;  %732 = vmatprep.mubr.msk.bf16.mxu0 %vm789_vm0, %v788_v2  ;;  %v346_v29 = vld [vmem:[%s306_s17] sm:$0xf] }
  0x15   : > { %743 = vmatpush3.bf16.msra.mxu1 %v775_v23 }
  0x16   : > { %v332_v21 = vadd.f32 %v331_v19, %v327_v14  ;;  %744 = vmatprep.subr.bf16.mxu1 %v788_v2 }
  0x18   : > { %v336_v24 = vrot.slane %v332_v21, %v335_v20 }
  0x19   : > { %745 = vmatpush3.bf16.msra.mxu1 %v776_v26 }
  0x1a   : > { %v337_v25 = vmul.f32 %v336_v24, %v320_v22  ;;  %746 = vmatprep.subr.bf16.mxu1 %v788_v2 }
  0x1c   : > { %v338_v27 = vpack.c.bf16 %v337_v25, %v337_v25 }
  0x1d   : > { %747 = vmatpush3.bf16.msra.mxu1 %v777_v30 }
  0x1e   : > { %v400_v28 = vsel %vm352_vm1, %v338_v27, 0  ;;  %748 = vmatprep.subr.bf16.mxu1 %v788_v2 }
  0x1f   : > { %731 = vmatpush3.bf16.msra.mxu0 %v400_v28 }
  0x21   : > { %749 = vmatpush3.bf16.msra.mxu1 %v778_v31 }
  0x22   : > { %733 = vmatmul.mubr.msk.bf16.vlgmr.msra.gmra.mrb[0].mxu0 %vm348_vm2, %v346_v29  ;;  %750 = vmatprep.subr.bf16.mxu1 %v788_v2 }
  0x25   : > { %751 = vmatpush3.bf16.msra.mxu1 %v779_v32 }
  0x93   : > { %v449_v34 = vpop.permute.xlu0 %448 }
  0x94   : > { %v451_v35 = vmul.f32 %v449_v34, %v444_v33 }
  0xf5   : > { %v436_v36 = vpop.f32.mrb[0].mxu0 }
  0xf6   : > { %v452_v37 = vsub.f32 %v451_v35, %v436_v36  ;;  %v734_v38 = vpop.f32.mrb[1].mxu0 }
  0xf7   : > { %v439_v39 = vpop.f32.mrb[2].mxu0 }
  0xf8   : > { %v453_v40 = vpack.c.bf16 %v452_v37, %v452_v37  ;;  %v735_v41 = vpop.f32.mrb[3].mxu0 }
  0xfa   : > { %753 = vmatmul.mubr.bf16.vlgmr.msra.gmra.mrb[0].mxu1 %v453_v40 }
 0x1cd   : > { %v552_v42 = vpop.f32.mrb[0].mxu1 }
 0x1ce   : > { %558 = vst [vmem:[%s314_s9] sm:$0xff] %v552_v42  ;;  %v559_v43 = vrot.slane %v552_v42, 4  ;;  %v565_v44 = vmul.f32 %v552_v42, %v552_v42  ;;  %v754_v45 = vpop.f32.mrb[1].mxu1 }
 0x1cf   : > { %v555_v46 = vpop.f32.mrb[2].mxu1 }
 0x1d0   : > { %v560_v47 = vadd.f32 %v559_v43, %v552_v42  ;;  %v566_v48 = vrot.slane %v565_v44, 4  ;;  %v755_v49 = vpop.f32.mrb[3].mxu1 }
 0x1d2   : > { %v561_v50 = vrot.slane %v560_v47, 2  ;;  %v567_v51 = vadd.f32 %v566_v48, %v565_v44 }
 0x1d4   : > { %v562_v52 = vadd.f32 %v561_v50, %v560_v47  ;;  %v568_v53 = vrot.slane %v567_v51, 2 }
 0x1d6   : > { %v563_v54 = vrot.slane %v562_v52, 1  ;;  %v569_v55 = vadd.f32 %v568_v53, %v567_v51 }
 0x1d8   : > { %v570_v56 = vrot.slane %v569_v55, 1  ;;  %v564_v57 = vadd.f32 %v563_v54, %v562_v52 }
 0x1da   : > { %v571_v58 = vadd.f32 %v570_v56, %v569_v55 }
 0x1dc   : > { %v573_v59 = vsel %vm572_vm3, %v564_v57, %v571_v58 }
 0x1dd   : > { %v575_v60 = vsel %vm574_vm4, %v573_v59, 0.0 }
 0x1de   : > { %576 = vst [vmem:[%s318_s11] sm:$0xff] %v575_v60 }
 0x1df PF: > { %s18_s24 = sadd.s32 1, %s786_s24  }
 0x1e0   : > { %p15_p4 = scmp.ge.s32.totalorder %s18_s24, 4  }
 0x1e2   :  { %17 = sbr.rel (!%p15_p4) target bundleno = 1 (0x1), region = 93 }

</bundles_post_ra>
